<compile_context>
chip_gen: v7x
topology: tpu7x:2x2x1
jax: 0.10.0
libtpu: 0.0.40
codegen_flags: <defaults>
</compile_context>

<pallas_src>
import functools

import jax
import jax.numpy as jnp
from jax.experimental import pallas as pl
from jax.experimental.pallas import tpu as pltpu

_LANES = 128      # TPU vreg lane width (fast axis)
_SUBLANES = 8     # TPU vreg sublane count (slow axis)


# -----------------------------------------------------------------------------
# Kernel: elementwise Swish on one lane-dense (block_rows, 128) tile.
# -----------------------------------------------------------------------------
def swish_kernel(x_ref, o_ref):
    x = x_ref[...].astype(jnp.float32)
    # jax.nn.sigmoid is the numerically stable logistic; exp goes to the EUP,
    # the multiply stays on the VPU.
    o_ref[...] = (x * jax.nn.sigmoid(x)).astype(o_ref.dtype)


# -----------------------------------------------------------------------------
# Wrapper: arbitrary-shape input -> lane-dense 2-D slab -> single pallas_call.
# -----------------------------------------------------------------------------
def swish(x, *, max_block_rows=2048):
    """Swish(x) = x * sigmoid(x), elementwise, any shape/dtype."""
    orig_shape = x.shape
    orig_dtype = x.dtype
    n = x.size

    # Flatten and map onto a (rows, 128) lane-dense layout.
    rows = pl.cdiv(n, _LANES)
    # Block rows: whole array if small (single grid step), else a 2048-row tile
    # (2048*128*4B = 1 MiB per buffer — far below VMEM on all generations).
    block_rows = min(pl.cdiv(rows, _SUBLANES) * _SUBLANES, max_block_rows)
    padded_rows = pl.cdiv(rows, block_rows) * block_rows
    padded_n = padded_rows * _LANES

    flat = x.reshape(-1)
    if padded_n != n:
        flat = jnp.pad(flat, (0, padded_n - n))
    x2d = flat.reshape(padded_rows, _LANES)

    grid = (padded_rows // block_rows,)
    out2d = pl.pallas_call(
        swish_kernel,
        grid=grid,
        in_specs=[pl.BlockSpec((block_rows, _LANES), lambda i: (i, 0))],
        out_specs=pl.BlockSpec((block_rows, _LANES), lambda i: (i, 0)),
        out_shape=jax.ShapeDtypeStruct((padded_rows, _LANES), orig_dtype),
        compiler_params=pltpu.CompilerParams(
            # Independent tiles: parallel lets v7x shard across its 2 TCs.
            dimension_semantics=("parallel",),
        ),
    )(x2d)

    return out2d.reshape(-1)[:n].reshape(orig_shape)


# -----------------------------------------------------------------------------
# Demo / self-check
# -----------------------------------------------------------------------------
if __name__ == "__main__":
    key = jax.random.PRNGKey(0)
    # Small shape consistent with the module (Swish is shape-agnostic):
    # batch=2, channels=4, spatial=16x16  ->  2048 elems = 16 x 128 (lane-dense).
    x = jax.random.normal(key, (2, 4, 16, 16), jnp.float32)

    fwd = jax.jit(swish)
    out = fwd(x)
    jax.block_until_ready(out)

    # Reference check against plain JAX: x * sigmoid(x)
    ref = x * jax.nn.sigmoid(x)
    assert out.shape == x.shape
    assert out.dtype == x.dtype
    assert bool(jnp.all(jnp.isfinite(out)))
    assert bool(jnp.allclose(out, ref, atol=1e-6, rtol=1e-6))

    print("KERNEL_OK")
</pallas_src>

<mosaic_0001>
module attributes {stable_mosaic.version = 11 : i64} {
  func.func @swish_kernel(%arg0: i32, %arg1: memref<16x128xf32, #tpu.memory_space<vmem>>, %arg2: memref<16x128xf32, #tpu.memory_space<vmem>>) attributes {dimension_semantics = [#tpu.dimension_semantics<parallel>], iteration_bounds = array<i64: 1>, scalar_prefetch = 0 : i64, scratch_operands = 0 : i64, tpu.core_type = #tpu.core_type<tc>, window_params = [{transform_indices = @transform_0, window_bounds = array<i64: 16, 128>}, {transform_indices = @transform_1, window_bounds = array<i64: 16, 128>}]} {
    %c0 = arith.constant 0 : index
    %c0_0 = arith.constant 0 : index
    %0 = vector.load %arg1[%c0, %c0_0] : memref<16x128xf32, #tpu.memory_space<vmem>>, vector<16x128xf32>
    %1 = arith.negf %0 : vector<16x128xf32>
    %2 = math.exp %1 : vector<16x128xf32>
    %cst = arith.constant 1.000000e+00 : f32
    %3 = vector.broadcast %cst : f32 to vector<16x128xf32>
    %4 = arith.addf %3, %2 : vector<16x128xf32>
    %5 = arith.divf %3, %4 : vector<16x128xf32>
    %6 = arith.mulf %0, %5 : vector<16x128xf32>
    %c0_1 = arith.constant 0 : index
    %c0_2 = arith.constant 0 : index
    %7 = vector.load %arg2[%c0_1, %c0_2] : memref<16x128xf32, #tpu.memory_space<vmem>>, vector<16x128xf32>
    tpu.vector_store %arg2[%c0_1, %c0_2], %6 {strides = array<i32>} : memref<16x128xf32, #tpu.memory_space<vmem>>, vector<16x128xf32>,
    return
  }
  func.func @transform_0(%arg0: i32) -> (i32, i32) {
    %c0_i32 = arith.constant 0 : i32
    %c0_i32_0 = arith.constant 0 : i32
    return %arg0, %c0_i32 : i32, i32
  }
  func.func @transform_1(%arg0: i32) -> (i32, i32) {
    %c0_i32 = arith.constant 0 : i32
    %c0_i32_0 = arith.constant 0 : i32
    return %arg0, %c0_i32 : i32, i32
  }
}

</mosaic_0001>

<bundles_post_ra>
// kernel: swish.1
= control target key start
LH: loop header
LB: loop body
LE: loop exit
PB: predicated region body
PF: predicated region fallthrough
CT: control target
= control target key end

     0   :  { %s62_s0 = inlined_call_operand.vmem [shape: f32[16,128], index: 0, kind: input, shape index: {}]   ;;  %s63_s1 = inlined_call_operand.vmem [shape: f32[16,128], index: 1, kind: output, shape index: {}]  }
   0x1   :  { %v8_v0 = vld [vmem:[%s62_s0] sm:$0xff]  ;;  %v9_v1 = vld [vmem:[%s62_s0 + $0x8] sm:$0xff] }
   0x2   :  { %v30_v2 = vmul.f32 -1.442695, %v8_v0  ;;  %v31_v3 = vmul.f32 -1.442695, %v9_v1 }
   0x4   :  { %32 = vpow2.f32 %v30_v2 }
   0x5   :  { %34 = vpow2.f32 %v31_v3 }
   0xe   :  { %v33_v4 = vpop.eup %32 }
   0xf   :  { %v35_v5 = vpop.eup %34  ;;  %v16_v6 = vadd.f32 1.0, %v33_v4 }
  0x10   :  { %v17_v7 = vadd.f32 1.0, %v35_v5 }
  0x11   :  { %36 = vrcp.f32 %v16_v6 }
  0x12   :  { %38 = vrcp.f32 %v17_v7 }
  0x1b   :  { %v37_v8 = vpop.eup %36 }
  0x1c   :  { %v39_v9 = vpop.eup %38  ;;  %v22_v10 = vmul.f32 %v37_v8, %v8_v0 }
  0x1d   :  { %v23_v11 = vmul.f32 %v39_v9, %v9_v1 }
  0x1e   :  { %24 = vst [vmem:[%s63_s1] sm:$0xff] %v22_v10 }
  0x1f   :  { %25 = vst [vmem:[%s63_s1 + $0x8] sm:$0xff] %v23_v11 }

</bundles_post_ra>
